<compile_context>
chip_gen: v5e
topology: v5e:2x2
jax: 0.10.0
libtpu: 0.0.40
codegen_flags: <defaults>
</compile_context>

<pallas_src>
import jax
import jax.numpy as jnp
from jax.experimental import pallas as pl
from jax.experimental.pallas import tpu as pltpu

LANE = 128
SUBLANE = 8


# ----------------------------- fused Pallas kernel ------------------------------

def _fused_sagpool_gcn_kernel(x_ref, a_unw_ref, a_w_ref, same_ref, k_ref, onehot_ref,
                              ws_ref, bs_ref, w1_ref, b1_ref, w2_ref, b2_ref,
                              w3_ref, b3_ref, wo_ref, bo_ref, o_ref):
    f32 = jnp.float32
    N = a_unw_ref.shape[0]

    row_i = jax.lax.broadcasted_iota(jnp.int32, (N, N), 0)
    col_i = jax.lax.broadcasted_iota(jnp.int32, (N, N), 1)
    eye = (row_i == col_i).astype(f32)
    ones_nn = jnp.ones((N, N), f32)

    def rowcast(v_col):
        # Exact [N,1] column vector -> [N,N] row-broadcast (each row = v^T), via MXU:
        # (ones @ diag(v))[i,j] = v[j].  Avoids in-kernel relayout transposes and is bit-exact.
        return jnp.dot(ones_nn, eye * v_col, preferred_element_type=f32)

    # ---- SAGPooling scorer: GCNConv(in_c, 1) on the UNWEIGHTED graph (PyG behavior) ----
    a0 = a_unw_ref[...] + eye
    deg0 = jnp.sum(a0, axis=1, keepdims=True)                                   # [N,1]
    d0 = jnp.where(deg0 > 0, jax.lax.rsqrt(jnp.maximum(deg0, 1e-30)), 0.0)
    p0 = d0 * a0 * rowcast(d0)                                                  # [N,N]
    xw = x_ref[...] * ws_ref[...]                                               # in_c == 1
    score = jnp.dot(p0, xw, preferred_element_type=f32) + bs_ref[...]           # [N,1]

    # ---- per-graph top-ceil(0.5*n) selection (ties broken by lower node index) ----
    s_row = rowcast(score)                                                      # s_row[i,j] = score[j]
    higher = ((s_row > score) | ((s_row == score) & (col_i < row_i))).astype(f32)
    rank = jnp.sum(same_ref[...] * higher, axis=1, keepdims=True)               # [N,1]
    mask = (rank < k_ref[...]).astype(f32)                                      # [N,1]

    # pooled node features (tanh-gated, dropped nodes zeroed), then `active` = ReLU
    h = jnp.maximum(x_ref[...] * (jnp.tanh(score) * mask), 0.0)                 # [N,1]

    # pooled-graph adjacency: edges between kept nodes only, self loops only on kept nodes,
    # then symmetric gcn_norm (identical to PyG filter + renormalize).
    m_row = rowcast(mask)
    a1 = a_w_ref[...] * mask * m_row + eye * mask
    deg1 = jnp.sum(a1, axis=1, keepdims=True)
    d1 = jnp.where(deg1 > 0, jax.lax.rsqrt(jnp.maximum(deg1, 1e-30)), 0.0)
    p1 = d1 * a1 * rowcast(d1)                                                  # [N,N]

    # ---- conv1/2/3 (+ReLU); hidden dim zero-padded to 128 lanes (exact) ----
    h = jnp.maximum(jnp.dot(p1, h * w1_ref[...], preferred_element_type=f32) + b1_ref[...], 0.0)
    h = jnp.maximum(jnp.dot(p1, jnp.dot(h, w2_ref[...], preferred_element_type=f32),
                            preferred_element_type=f32) + b2_ref[...], 0.0)
    h = jnp.maximum(jnp.dot(p1, jnp.dot(h, w3_ref[...], preferred_element_type=f32),
                            preferred_element_type=f32) + b3_ref[...], 0.0)     # [N, H_PAD]

    # ---- global_mean_pool over kept nodes, Linear head, log_softmax ----
    # sel[g,j] = onehot[g,j] * mask[j]  (exact, via diag-matmul)
    sel = jnp.dot(onehot_ref[...], eye * mask, preferred_element_type=f32)      # [G_PAD, N]
    counts = jnp.maximum(jnp.sum(sel, axis=1, keepdims=True), 1.0)
    pooled = jnp.dot(sel, h, preferred_element_type=f32) / counts               # [G_PAD, H_PAD]
    # TODO(synk): F.dropout(p=0.5) assumed eval-mode (identity); training-mode dropout not implemented.
    logits = jnp.dot(pooled, wo_ref[...], preferred_element_type=f32) + bo_ref[...]  # [G_PAD, 128]
    mx = jnp.max(logits, axis=-1, keepdims=True)
    s = logits - mx
    o_ref[...] = s - jnp.log(jnp.sum(jnp.exp(s), axis=-1, keepdims=True))


# --------------------------------- JAX glue -------------------------------------

def dense_adj(edge_idx, edge_weight, num_nodes):
    """A[dst, src] = edge weight (messages flow src -> dst)."""
    src, dst = edge_idx[0], edge_idx[1]
    A = jnp.zeros((num_nodes, num_nodes), jnp.float32)
    return A.at[dst, src].add(edge_weight)


def _pad2(a, rows, cols, fill=0.0):
    return jnp.pad(a, ((0, rows - a.shape[0]), (0, cols - a.shape[1])),
                   constant_values=fill)


def init_params(key, in_c, hidden, out_c):
    ks = jax.random.split(key, 5)

    def w(k, shape):
        return jax.random.normal(k, shape, jnp.float32) * 0.1

    return dict(
        w_score=w(ks[0], (in_c, 1)),       b_score=jnp.zeros((1, 1), jnp.float32),
        w1=w(ks[1], (in_c, hidden)),       b1=jnp.zeros((1, hidden), jnp.float32),
        w2=w(ks[2], (hidden, hidden)),     b2=jnp.zeros((1, hidden), jnp.float32),
        w3=w(ks[3], (hidden, hidden)),     b3=jnp.zeros((1, hidden), jnp.float32),
        w_out=w(ks[4], (hidden, out_c)),   b_out=jnp.zeros((1, out_c), jnp.float32),
    )


def model_sagpool_gcn_forward(params, x, edge_idx, edge_weight, batch, num_graphs,
                              ratio=0.5):
    N = x.shape[0]
    HID = params["w1"].shape[1]
    OUT_C = params["w_out"].shape[1]
    H_PAD = max(LANE, -(-HID // LANE) * LANE)          # lane-dense hidden width
    C_PAD = LANE                                        # lane-dense classifier width
    G_PAD = -(-num_graphs // SUBLANE) * SUBLANE         # sublane-dense graph rows

    # Dense adjacencies (scatter-add kept in plain JAX) and static per-graph metadata.
    A_unw = dense_adj(edge_idx, jnp.ones_like(edge_weight), N)
    A_w = dense_adj(edge_idx, edge_weight, N)
    same = (batch[:, None] == batch[None, :]).astype(jnp.float32)               # [N,N]
    n_g = jnp.sum(same, axis=1, keepdims=True)
    k_col = jnp.ceil(ratio * n_g).astype(jnp.float32)                           # [N,1]
    onehot = (batch[None, :] == jnp.arange(num_graphs)[:, None]).astype(jnp.float32)
    onehot = _pad2(onehot, G_PAD, N)                                            # [G_PAD, N]

    # Zero-pad parameters to lane-dense widths (exact; padded logit lanes get -1e30 bias).
    w1p = _pad2(params["w1"], 1, H_PAD)
    b1p = _pad2(params["b1"], 1, H_PAD)
    w2p = _pad2(params["w2"], H_PAD, H_PAD)
    b2p = _pad2(params["b2"], 1, H_PAD)
    w3p = _pad2(params["w3"], H_PAD, H_PAD)
    b3p = _pad2(params["b3"], 1, H_PAD)
    wop = _pad2(params["w_out"], H_PAD, C_PAD)
    bop = jnp.pad(params["b_out"], ((0, 0), (0, C_PAD - OUT_C)),
                  constant_values=-1e30)

    args = (x, A_unw, A_w, same, k_col, onehot,
            params["w_score"], params["b_score"],
            w1p, b1p, w2p, b2p, w3p, b3p, wop, bop)

    def full_spec(a):
        return pl.BlockSpec(a.shape, lambda i: (0, 0))

    flops = (
        4 * 2 * N * N * N                      # diag-matmul row-broadcasts
        + 2 * N * N * 1                        # scorer propagation
        + 3 * 2 * N * N * H_PAD                # conv1/2/3 propagation
        + 2 * 2 * N * H_PAD * H_PAD            # conv2/3 feature transforms
        + 2 * G_PAD * N * H_PAD                # mean pool
        + 2 * G_PAD * H_PAD * C_PAD            # output linear
    )
    transcendentals = 3 * N + G_PAD * (C_PAD + 1)
    bytes_accessed = sum(int(a.size) * 4 for a in args) + G_PAD * C_PAD * 4

    out = pl.pallas_call(
        _fused_sagpool_gcn_kernel,
        out_shape=jax.ShapeDtypeStruct((G_PAD, C_PAD), jnp.float32),
        grid=(1,),
        in_specs=[full_spec(a) for a in args],
        out_specs=pl.BlockSpec((G_PAD, C_PAD), lambda i: (0, 0)),
        compiler_params=pltpu.CompilerParams(dimension_semantics=("arbitrary",)),
        cost_estimate=pl.CostEstimate(flops=flops,
                                      transcendentals=transcendentals,
                                      bytes_accessed=bytes_accessed),
    )(*args)

    return out[:num_graphs, :OUT_C]


# ----------------------------------- main ----------------------------------------

if __name__ == "__main__":
    key = jax.random.PRNGKey(0)
    N_PER_G, G = 8, 2
    N = N_PER_G * G
    IN_C, HID, OUT_C = 1, 32, 4   # conv1 = GCNConv(1, hidden) => input_channels == 1

    k_x, k_w, k_p = jax.random.split(key, 3)
    x = jax.random.normal(k_x, (N, IN_C), jnp.float32)

    # Bidirectional ring edges inside each graph (deterministic).
    src, dst = [], []
    for g in range(G):
        for i in range(N_PER_G):
            a = g * N_PER_G + i
            b = g * N_PER_G + (i + 1) % N_PER_G
            src += [a, b]
            dst += [b, a]
    edge_idx = jnp.array([src, dst], dtype=jnp.int32)          # [2, E]
    edge_weight = jax.random.uniform(k_w, (edge_idx.shape[1],), jnp.float32, 0.5, 1.5)
    batch = jnp.repeat(jnp.arange(G, dtype=jnp.int32), N_PER_G)

    params = init_params(k_p, IN_C, HID, OUT_C)

    out = model_sagpool_gcn_forward(params, x, edge_idx, edge_weight, batch, G)
    out = jax.block_until_ready(out)
    assert out.shape == (G, OUT_C)
    assert bool(jnp.all(jnp.isfinite(out)))
    print("KERNEL_OK")
</pallas_src>

<mosaic_0001>
module attributes {stable_mosaic.version = 11 : i64} {
  func.func @_fused_sagpool_gcn_kernel(%arg0: i32, %arg1: memref<16x1xf32, #tpu.memory_space<vmem>>, %arg2: memref<16x16xf32, #tpu.memory_space<vmem>>, %arg3: memref<16x16xf32, #tpu.memory_space<vmem>>, %arg4: memref<16x16xf32, #tpu.memory_space<vmem>>, %arg5: memref<16x1xf32, #tpu.memory_space<vmem>>, %arg6: memref<8x16xf32, #tpu.memory_space<vmem>>, %arg7: memref<1x1xf32, #tpu.memory_space<vmem>>, %arg8: memref<1x1xf32, #tpu.memory_space<vmem>>, %arg9: memref<1x128xf32, #tpu.memory_space<vmem>>, %arg10: memref<1x128xf32, #tpu.memory_space<vmem>>, %arg11: memref<128x128xf32, #tpu.memory_space<vmem>>, %arg12: memref<1x128xf32, #tpu.memory_space<vmem>>, %arg13: memref<128x128xf32, #tpu.memory_space<vmem>>, %arg14: memref<1x128xf32, #tpu.memory_space<vmem>>, %arg15: memref<128x128xf32, #tpu.memory_space<vmem>>, %arg16: memref<1x128xf32, #tpu.memory_space<vmem>>, %arg17: memref<8x128xf32, #tpu.memory_space<vmem>>) attributes {dimension_semantics = [#tpu.dimension_semantics<arbitrary>], iteration_bounds = array<i64: 1>, scalar_prefetch = 0 : i64, scratch_operands = 0 : i64, tpu.core_type = #tpu.core_type<tc>, window_params = [{pipeline_mode = #tpu.pipeline_mode<synchronous>, transform_indices = @transform_0, window_bounds = array<i64: 16, 1>}, {pipeline_mode = #tpu.pipeline_mode<synchronous>, transform_indices = @transform_1, window_bounds = array<i64: 16, 16>}, {pipeline_mode = #tpu.pipeline_mode<synchronous>, transform_indices = @transform_2, window_bounds = array<i64: 16, 16>}, {pipeline_mode = #tpu.pipeline_mode<synchronous>, transform_indices = @transform_3, window_bounds = array<i64: 16, 16>}, {pipeline_mode = #tpu.pipeline_mode<synchronous>, transform_indices = @transform_4, window_bounds = array<i64: 16, 1>}, {pipeline_mode = #tpu.pipeline_mode<synchronous>, transform_indices = @transform_5, window_bounds = array<i64: 8, 16>}, {pipeline_mode = #tpu.pipeline_mode<synchronous>, transform_indices = @transform_6, window_bounds = array<i64: 1, 1>}, {pipeline_mode = #tpu.pipeline_mode<synchronous>, transform_indices = @transform_7, window_bounds = array<i64: 1, 1>}, {pipeline_mode = #tpu.pipeline_mode<synchronous>, transform_indices = @transform_8, window_bounds = array<i64: 1, 128>}, {pipeline_mode = #tpu.pipeline_mode<synchronous>, transform_indices = @transform_9, window_bounds = array<i64: 1, 128>}, {pipeline_mode = #tpu.pipeline_mode<synchronous>, transform_indices = @transform_10, window_bounds = array<i64: 128, 128>}, {pipeline_mode = #tpu.pipeline_mode<synchronous>, transform_indices = @transform_11, window_bounds = array<i64: 1, 128>}, {pipeline_mode = #tpu.pipeline_mode<synchronous>, transform_indices = @transform_12, window_bounds = array<i64: 128, 128>}, {pipeline_mode = #tpu.pipeline_mode<synchronous>, transform_indices = @transform_13, window_bounds = array<i64: 1, 128>}, {pipeline_mode = #tpu.pipeline_mode<synchronous>, transform_indices = @transform_14, window_bounds = array<i64: 128, 128>}, {pipeline_mode = #tpu.pipeline_mode<synchronous>, transform_indices = @transform_15, window_bounds = array<i64: 1, 128>}, {pipeline_mode = #tpu.pipeline_mode<synchronous>, transform_indices = @transform_16, window_bounds = array<i64: 8, 128>}]} {
    %0 = tpu.iota {dimensions = array<i32: 0>} : vector<16x16xi32>
    %1 = tpu.iota {dimensions = array<i32: 1>} : vector<16x16xi32>
    %2 = arith.cmpi eq, %0, %1 : vector<16x16xi32>
    %3 = arith.extui %2 : vector<16x16xi1> to vector<16x16xi32>
    %4 = arith.sitofp %3 : vector<16x16xi32> to vector<16x16xf32>
    %cst = arith.constant 1.000000e+00 : f32
    %5 = vector.broadcast %cst : f32 to vector<16x16xf32>
    %c0 = arith.constant 0 : index
    %c0_0 = arith.constant 0 : index
    %6 = vector.load %arg2[%c0, %c0_0] : memref<16x16xf32, #tpu.memory_space<vmem>>, vector<16x16xf32>
    %7 = arith.addf %6, %4 : vector<16x16xf32>
    %cst_1 = arith.constant dense<0.000000e+00> : vector<16xf32>
    %8 = vector.multi_reduction <add>, %7, %cst_1 [1] : vector<16x16xf32> to vector<16xf32>
    %9 = vector.shape_cast %8 : vector<16xf32> to vector<16x1xf32>
    %cst_2 = arith.constant 0.000000e+00 : f32
    %10 = vector.broadcast %cst_2 : f32 to vector<16x1xf32>
    %11 = arith.cmpf ogt, %9, %10 : vector<16x1xf32>
    %cst_3 = arith.constant 1.000000e-30 : f32
    %12 = vector.broadcast %cst_3 : f32 to vector<16x1xf32>
    %13 = arith.maximumf %9, %12 : vector<16x1xf32>
    %14 = math.rsqrt %13 : vector<16x1xf32>
    %cst_4 = arith.constant 0.000000e+00 : f32
    %15 = vector.broadcast %cst_4 : f32 to vector<16x1xf32>
    %16 = arith.select %11, %14, %15 : vector<16x1xi1>, vector<16x1xf32>
    %17 = vector.broadcast %16 : vector<16x1xf32> to vector<16x16xf32>
    %18 = arith.mulf %17, %7 : vector<16x16xf32>
    %19 = vector.broadcast %16 : vector<16x1xf32> to vector<16x16xf32>
    %20 = arith.mulf %4, %19 : vector<16x16xf32>
    %cst_5 = arith.constant dense<0.000000e+00> : vector<16x16xf32>
    %21 = tpu.matmul %5, %20, %cst_5 {dimension_numbers = #tpu.dot_dimension_numbers<[1], [0], [0], [1], [0, 0, 1, 1], [], []>} : vector<16x16xf32>, vector<16x16xf32>, vector<16x16xf32> -> vector<16x16xf32>
    %22 = arith.mulf %18, %21 : vector<16x16xf32>
    %c0_6 = arith.constant 0 : index
    %c0_7 = arith.constant 0 : index
    %23 = vector.load %arg1[%c0_6, %c0_7] : memref<16x1xf32, #tpu.memory_space<vmem>>, vector<16x1xf32>
    %c0_8 = arith.constant 0 : index
    %c0_9 = arith.constant 0 : index
    %24 = vector.load %arg7[%c0_8, %c0_9] : memref<1x1xf32, #tpu.memory_space<vmem>>, vector<1x1xf32>
    %25 = vector.broadcast %24 : vector<1x1xf32> to vector<16x1xf32>
    %26 = arith.mulf %23, %25 : vector<16x1xf32>
    %cst_10 = arith.constant dense<0.000000e+00> : vector<16x1xf32>
    %27 = tpu.matmul %22, %26, %cst_10 {dimension_numbers = #tpu.dot_dimension_numbers<[1], [0], [0], [1], [0, 0, 1, 1], [], []>} : vector<16x16xf32>, vector<16x1xf32>, vector<16x1xf32> -> vector<16x1xf32>
    %c0_11 = arith.constant 0 : index
    %c0_12 = arith.constant 0 : index
    %28 = vector.load %arg8[%c0_11, %c0_12] : memref<1x1xf32, #tpu.memory_space<vmem>>, vector<1x1xf32>
    %29 = vector.broadcast %28 : vector<1x1xf32> to vector<16x1xf32>
    %30 = arith.addf %27, %29 : vector<16x1xf32>
    %31 = vector.broadcast %30 : vector<16x1xf32> to vector<16x16xf32>
    %32 = arith.mulf %4, %31 : vector<16x16xf32>
    %cst_13 = arith.constant dense<0.000000e+00> : vector<16x16xf32>
    %33 = tpu.matmul %5, %32, %cst_13 {dimension_numbers = #tpu.dot_dimension_numbers<[1], [0], [0], [1], [0, 0, 1, 1], [], []>} : vector<16x16xf32>, vector<16x16xf32>, vector<16x16xf32> -> vector<16x16xf32>
    %34 = vector.broadcast %30 : vector<16x1xf32> to vector<16x16xf32>
    %35 = arith.cmpf ogt, %33, %34 : vector<16x16xf32>
    %36 = vector.broadcast %30 : vector<16x1xf32> to vector<16x16xf32>
    %37 = arith.cmpf oeq, %33, %36 : vector<16x16xf32>
    %38 = arith.cmpi slt, %1, %0 : vector<16x16xi32>
    %39 = arith.andi %37, %38 : vector<16x16xi1>
    %40 = arith.ori %35, %39 : vector<16x16xi1>
    %41 = arith.extui %40 : vector<16x16xi1> to vector<16x16xi32>
    %42 = arith.sitofp %41 : vector<16x16xi32> to vector<16x16xf32>
    %c0_14 = arith.constant 0 : index
    %c0_15 = arith.constant 0 : index
    %43 = vector.load %arg4[%c0_14, %c0_15] : memref<16x16xf32, #tpu.memory_space<vmem>>, vector<16x16xf32>
    %44 = arith.mulf %43, %42 : vector<16x16xf32>
    %cst_16 = arith.constant dense<0.000000e+00> : vector<16xf32>
    %45 = vector.multi_reduction <add>, %44, %cst_16 [1] : vector<16x16xf32> to vector<16xf32>
    %46 = vector.shape_cast %45 : vector<16xf32> to vector<16x1xf32>
    %c0_17 = arith.constant 0 : index
    %c0_18 = arith.constant 0 : index
    %47 = vector.load %arg5[%c0_17, %c0_18] : memref<16x1xf32, #tpu.memory_space<vmem>>, vector<16x1xf32>
    %48 = arith.cmpf olt, %46, %47 : vector<16x1xf32>
    %49 = arith.extui %48 : vector<16x1xi1> to vector<16x1xi32>
    %50 = arith.sitofp %49 : vector<16x1xi32> to vector<16x1xf32>
    %c0_19 = arith.constant 0 : index
    %c0_20 = arith.constant 0 : index
    %51 = vector.load %arg1[%c0_19, %c0_20] : memref<16x1xf32, #tpu.memory_space<vmem>>, vector<16x1xf32>
    %52 = math.tanh %30 : vector<16x1xf32>
    %53 = arith.mulf %52, %50 : vector<16x1xf32>
    %54 = arith.mulf %51, %53 : vector<16x1xf32>
    %cst_21 = arith.constant 0.000000e+00 : f32
    %55 = vector.broadcast %cst_21 : f32 to vector<16x1xf32>
    %56 = arith.maximumf %54, %55 : vector<16x1xf32>
    %57 = vector.broadcast %50 : vector<16x1xf32> to vector<16x16xf32>
    %58 = arith.mulf %4, %57 : vector<16x16xf32>
    %cst_22 = arith.constant dense<0.000000e+00> : vector<16x16xf32>
    %59 = tpu.matmul %5, %58, %cst_22 {dimension_numbers = #tpu.dot_dimension_numbers<[1], [0], [0], [1], [0, 0, 1, 1], [], []>} : vector<16x16xf32>, vector<16x16xf32>, vector<16x16xf32> -> vector<16x16xf32>
    %c0_23 = arith.constant 0 : index
    %c0_24 = arith.constant 0 : index
    %60 = vector.load %arg3[%c0_23, %c0_24] : memref<16x16xf32, #tpu.memory_space<vmem>>, vector<16x16xf32>
    %61 = vector.broadcast %50 : vector<16x1xf32> to vector<16x16xf32>
    %62 = arith.mulf %60, %61 : vector<16x16xf32>
    %63 = arith.mulf %62, %59 : vector<16x16xf32>
    %64 = vector.broadcast %50 : vector<16x1xf32> to vector<16x16xf32>
    %65 = arith.mulf %4, %64 : vector<16x16xf32>
    %66 = arith.addf %63, %65 : vector<16x16xf32>
    %cst_25 = arith.constant dense<0.000000e+00> : vector<16xf32>
    %67 = vector.multi_reduction <add>, %66, %cst_25 [1] : vector<16x16xf32> to vector<16xf32>
    %68 = vector.shape_cast %67 : vector<16xf32> to vector<16x1xf32>
    %cst_26 = arith.constant 0.000000e+00 : f32
    %69 = vector.broadcast %cst_26 : f32 to vector<16x1xf32>
    %70 = arith.cmpf ogt, %68, %69 : vector<16x1xf32>
    %cst_27 = arith.constant 1.000000e-30 : f32
    %71 = vector.broadcast %cst_27 : f32 to vector<16x1xf32>
    %72 = arith.maximumf %68, %71 : vector<16x1xf32>
    %73 = math.rsqrt %72 : vector<16x1xf32>
    %cst_28 = arith.constant 0.000000e+00 : f32
    %74 = vector.broadcast %cst_28 : f32 to vector<16x1xf32>
    %75 = arith.select %70, %73, %74 : vector<16x1xi1>, vector<16x1xf32>
    %76 = vector.broadcast %75 : vector<16x1xf32> to vector<16x16xf32>
    %77 = arith.mulf %76, %66 : vector<16x16xf32>
    %78 = vector.broadcast %75 : vector<16x1xf32> to vector<16x16xf32>
    %79 = arith.mulf %4, %78 : vector<16x16xf32>
    %cst_29 = arith.constant dense<0.000000e+00> : vector<16x16xf32>
    %80 = tpu.matmul %5, %79, %cst_29 {dimension_numbers = #tpu.dot_dimension_numbers<[1], [0], [0], [1], [0, 0, 1, 1], [], []>} : vector<16x16xf32>, vector<16x16xf32>, vector<16x16xf32> -> vector<16x16xf32>
    %81 = arith.mulf %77, %80 : vector<16x16xf32>
    %c0_30 = arith.constant 0 : index
    %c0_31 = arith.constant 0 : index
    %82 = vector.load %arg9[%c0_30, %c0_31] : memref<1x128xf32, #tpu.memory_space<vmem>>, vector<1x128xf32>
    %83 = vector.broadcast %56 : vector<16x1xf32> to vector<16x128xf32>
    %84 = vector.broadcast %82 : vector<1x128xf32> to vector<16x128xf32>
    %85 = arith.mulf %83, %84 : vector<16x128xf32>
    %cst_32 = arith.constant dense<0.000000e+00> : vector<16x128xf32>
    %86 = tpu.matmul %81, %85, %cst_32 {dimension_numbers = #tpu.dot_dimension_numbers<[1], [0], [0], [1], [0, 0, 1, 1], [], []>} : vector<16x16xf32>, vector<16x128xf32>, vector<16x128xf32> -> vector<16x128xf32>
    %c0_33 = arith.constant 0 : index
    %c0_34 = arith.constant 0 : index
    %87 = vector.load %arg10[%c0_33, %c0_34] : memref<1x128xf32, #tpu.memory_space<vmem>>, vector<1x128xf32>
    %88 = vector.broadcast %87 : vector<1x128xf32> to vector<16x128xf32>
    %89 = arith.addf %86, %88 : vector<16x128xf32>
    %cst_35 = arith.constant 0.000000e+00 : f32
    %90 = vector.broadcast %cst_35 : f32 to vector<16x128xf32>
    %91 = arith.maximumf %89, %90 : vector<16x128xf32>
    %c0_36 = arith.constant 0 : index
    %c0_37 = arith.constant 0 : index
    %92 = vector.load %arg11[%c0_36, %c0_37] : memref<128x128xf32, #tpu.memory_space<vmem>>, vector<128x128xf32>
    %cst_38 = arith.constant dense<0.000000e+00> : vector<16x128xf32>
    %93 = tpu.matmul %91, %92, %cst_38 {dimension_numbers = #tpu.dot_dimension_numbers<[1], [0], [0], [1], [0, 0, 1, 1], [], []>} : vector<16x128xf32>, vector<128x128xf32>, vector<16x128xf32> -> vector<16x128xf32>
    %cst_39 = arith.constant dense<0.000000e+00> : vector<16x128xf32>
    %94 = tpu.matmul %81, %93, %cst_39 {dimension_numbers = #tpu.dot_dimension_numbers<[1], [0], [0], [1], [0, 0, 1, 1], [], []>} : vector<16x16xf32>, vector<16x128xf32>, vector<16x128xf32> -> vector<16x128xf32>
    %c0_40 = arith.constant 0 : index
    %c0_41 = arith.constant 0 : index
    %95 = vector.load %arg12[%c0_40, %c0_41] : memref<1x128xf32, #tpu.memory_space<vmem>>, vector<1x128xf32>
    %96 = vector.broadcast %95 : vector<1x128xf32> to vector<16x128xf32>
    %97 = arith.addf %94, %96 : vector<16x128xf32>
    %cst_42 = arith.constant 0.000000e+00 : f32
    %98 = vector.broadcast %cst_42 : f32 to vector<16x128xf32>
    %99 = arith.maximumf %97, %98 : vector<16x128xf32>
    %c0_43 = arith.constant 0 : index
    %c0_44 = arith.constant 0 : index
    %100 = vector.load %arg13[%c0_43, %c0_44] : memref<128x128xf32, #tpu.memory_space<vmem>>, vector<128x128xf32>
    %cst_45 = arith.constant dense<0.000000e+00> : vector<16x128xf32>
    %101 = tpu.matmul %99, %100, %cst_45 {dimension_numbers = #tpu.dot_dimension_numbers<[1], [0], [0], [1], [0, 0, 1, 1], [], []>} : vector<16x128xf32>, vector<128x128xf32>, vector<16x128xf32> -> vector<16x128xf32>
    %cst_46 = arith.constant dense<0.000000e+00> : vector<16x128xf32>
    %102 = tpu.matmul %81, %101, %cst_46 {dimension_numbers = #tpu.dot_dimension_numbers<[1], [0], [0], [1], [0, 0, 1, 1], [], []>} : vector<16x16xf32>, vector<16x128xf32>, vector<16x128xf32> -> vector<16x128xf32>
    %c0_47 = arith.constant 0 : index
    %c0_48 = arith.constant 0 : index
    %103 = vector.load %arg14[%c0_47, %c0_48] : memref<1x128xf32, #tpu.memory_space<vmem>>, vector<1x128xf32>
    %104 = vector.broadcast %103 : vector<1x128xf32> to vector<16x128xf32>
    %105 = arith.addf %102, %104 : vector<16x128xf32>
    %cst_49 = arith.constant 0.000000e+00 : f32
    %106 = vector.broadcast %cst_49 : f32 to vector<16x128xf32>
    %107 = arith.maximumf %105, %106 : vector<16x128xf32>
    %c0_50 = arith.constant 0 : index
    %c0_51 = arith.constant 0 : index
    %108 = vector.load %arg6[%c0_50, %c0_51] : memref<8x16xf32, #tpu.memory_space<vmem>>, vector<8x16xf32>
    %109 = vector.broadcast %50 : vector<16x1xf32> to vector<16x16xf32>
    %110 = arith.mulf %4, %109 : vector<16x16xf32>
    %cst_52 = arith.constant dense<0.000000e+00> : vector<8x16xf32>
    %111 = tpu.matmul %108, %110, %cst_52 {dimension_numbers = #tpu.dot_dimension_numbers<[1], [0], [0], [1], [0, 0, 1, 1], [], []>} : vector<8x16xf32>, vector<16x16xf32>, vector<8x16xf32> -> vector<8x16xf32>
    %cst_53 = arith.constant dense<0.000000e+00> : vector<8xf32>
    %112 = vector.multi_reduction <add>, %111, %cst_53 [1] : vector<8x16xf32> to vector<8xf32>
    %113 = vector.shape_cast %112 : vector<8xf32> to vector<8x1xf32>
    %cst_54 = arith.constant 1.000000e+00 : f32
    %114 = vector.broadcast %cst_54 : f32 to vector<8x1xf32>
    %115 = arith.maximumf %113, %114 : vector<8x1xf32>
    %cst_55 = arith.constant dense<0.000000e+00> : vector<8x128xf32>
    %116 = tpu.matmul %111, %107, %cst_55 {dimension_numbers = #tpu.dot_dimension_numbers<[1], [0], [0], [1], [0, 0, 1, 1], [], []>} : vector<8x16xf32>, vector<16x128xf32>, vector<8x128xf32> -> vector<8x128xf32>
    %117 = vector.broadcast %115 : vector<8x1xf32> to vector<8x128xf32>
    %118 = arith.divf %116, %117 : vector<8x128xf32>
    %c0_56 = arith.constant 0 : index
    %c0_57 = arith.constant 0 : index
    %119 = vector.load %arg15[%c0_56, %c0_57] : memref<128x128xf32, #tpu.memory_space<vmem>>, vector<128x128xf32>
    %cst_58 = arith.constant dense<0.000000e+00> : vector<8x128xf32>
    %120 = tpu.matmul %118, %119, %cst_58 {dimension_numbers = #tpu.dot_dimension_numbers<[1], [0], [0], [1], [0, 0, 1, 1], [], []>} : vector<8x128xf32>, vector<128x128xf32>, vector<8x128xf32> -> vector<8x128xf32>
    %c0_59 = arith.constant 0 : index
    %c0_60 = arith.constant 0 : index
    %121 = vector.load %arg16[%c0_59, %c0_60] : memref<1x128xf32, #tpu.memory_space<vmem>>, vector<1x128xf32>
    %122 = vector.broadcast %121 : vector<1x128xf32> to vector<8x128xf32>
    %123 = arith.addf %120, %122 : vector<8x128xf32>
    %cst_61 = arith.constant dense<0xFF800000> : vector<8xf32>
    %124 = vector.multi_reduction <maximumf>, %123, %cst_61 [1] : vector<8x128xf32> to vector<8xf32>
    %125 = vector.shape_cast %124 : vector<8xf32> to vector<8x1xf32>
    %126 = vector.broadcast %125 : vector<8x1xf32> to vector<8x128xf32>
    %127 = arith.subf %123, %126 : vector<8x128xf32>
    %128 = math.exp %127 : vector<8x128xf32>
    %cst_62 = arith.constant dense<0.000000e+00> : vector<8xf32>
    %129 = vector.multi_reduction <add>, %128, %cst_62 [1] : vector<8x128xf32> to vector<8xf32>
    %130 = vector.shape_cast %129 : vector<8xf32> to vector<8x1xf32>
    %131 = math.log %130 : vector<8x1xf32>
    %132 = vector.broadcast %131 : vector<8x1xf32> to vector<8x128xf32>
    %133 = arith.subf %127, %132 : vector<8x128xf32>
    %c0_63 = arith.constant 0 : index
    %c0_64 = arith.constant 0 : index
    %134 = vector.load %arg17[%c0_63, %c0_64] : memref<8x128xf32, #tpu.memory_space<vmem>>, vector<8x128xf32>
    tpu.vector_store %arg17[%c0_63, %c0_64], %133 {strides = array<i32>} : memref<8x128xf32, #tpu.memory_space<vmem>>, vector<8x128xf32>,
    return
  }
  func.func @transform_0(%arg0: i32) -> (i32, i32) {
    %c0_i32 = arith.constant 0 : i32
    %c0_i32_0 = arith.constant 0 : i32
    %c0_i32_1 = arith.constant 0 : i32
    return %c0_i32, %c0_i32_0 : i32, i32
  }
  func.func @transform_1(%arg0: i32) -> (i32, i32) {
    %c0_i32 = arith.constant 0 : i32
    %c0_i32_0 = arith.constant 0 : i32
    %c0_i32_1 = arith.constant 0 : i32
    return %c0_i32, %c0_i32_0 : i32, i32
  }
  func.func @transform_2(%arg0: i32) -> (i32, i32) {
    %c0_i32 = arith.constant 0 : i32
    %c0_i32_0 = arith.constant 0 : i32
    %c0_i32_1 = arith.constant 0 : i32
    return %c0_i32, %c0_i32_0 : i32, i32
  }
  func.func @transform_3(%arg0: i32) -> (i32, i32) {
    %c0_i32 = arith.constant 0 : i32
    %c0_i32_0 = arith.constant 0 : i32
    %c0_i32_1 = arith.constant 0 : i32
    return %c0_i32, %c0_i32_0 : i32, i32
  }
  func.func @transform_4(%arg0: i32) -> (i32, i32) {
    %c0_i32 = arith.constant 0 : i32
    %c0_i32_0 = arith.constant 0 : i32
    %c0_i32_1 = arith.constant 0 : i32
    return %c0_i32, %c0_i32_0 : i32, i32
  }
  func.func @transform_5(%arg0: i32) -> (i32, i32) {
    %c0_i32 = arith.constant 0 : i32
    %c0_i32_0 = arith.constant 0 : i32
    %c0_i32_1 = arith.constant 0 : i32
    return %c0_i32, %c0_i32_0 : i32, i32
  }
  func.func @transform_6(%arg0: i32) -> (i32, i32) {
    %c0_i32 = arith.constant 0 : i32
    %c0_i32_0 = arith.constant 0 : i32
    %c0_i32_1 = arith.constant 0 : i32
    return %c0_i32, %c0_i32_0 : i32, i32
  }
  func.func @transform_7(%arg0: i32) -> (i32, i32) {
    %c0_i32 = arith.constant 0 : i32
    %c0_i32_0 = arith.constant 0 : i32
    %c0_i32_1 = arith.constant 0 : i32
    return %c0_i32, %c0_i32_0 : i32, i32
  }
  func.func @transform_8(%arg0: i32) -> (i32, i32) {
    %c0_i32 = arith.constant 0 : i32
    %c0_i32_0 = arith.constant 0 : i32
    %c0_i32_1 = arith.constant 0 : i32
    return %c0_i32, %c0_i32_0 : i32, i32
  }
  func.func @transform_9(%arg0: i32) -> (i32, i32) {
    %c0_i32 = arith.constant 0 : i32
    %c0_i32_0 = arith.constant 0 : i32
    %c0_i32_1 = arith.constant 0 : i32
    return %c0_i32, %c0_i32_0 : i32, i32
  }
  func.func @transform_10(%arg0: i32) -> (i32, i32) {
    %c0_i32 = arith.constant 0 : i32
    %c0_i32_0 = arith.constant 0 : i32
    %c0_i32_1 = arith.constant 0 : i32
    return %c0_i32, %c0_i32_0 : i32, i32
  }
  func.func @transform_11(%arg0: i32) -> (i32, i32) {
    %c0_i32 = arith.constant 0 : i32
    %c0_i32_0 = arith.constant 0 : i32
    %c0_i32_1 = arith.constant 0 : i32
    return %c0_i32, %c0_i32_0 : i32, i32
  }
  func.func @transform_12(%arg0: i32) -> (i32, i32) {
    %c0_i32 = arith.constant 0 : i32
    %c0_i32_0 = arith.constant 0 : i32
    %c0_i32_1 = arith.constant 0 : i32
    return %c0_i32, %c0_i32_0 : i32, i32
  }
  func.func @transform_13(%arg0: i32) -> (i32, i32) {
    %c0_i32 = arith.constant 0 : i32
    %c0_i32_0 = arith.constant 0 : i32
    %c0_i32_1 = arith.constant 0 : i32
    return %c0_i32, %c0_i32_0 : i32, i32
  }
  func.func @transform_14(%arg0: i32) -> (i32, i32) {
    %c0_i32 = arith.constant 0 : i32
    %c0_i32_0 = arith.constant 0 : i32
    %c0_i32_1 = arith.constant 0 : i32
    return %c0_i32, %c0_i32_0 : i32, i32
  }
  func.func @transform_15(%arg0: i32) -> (i32, i32) {
    %c0_i32 = arith.constant 0 : i32
    %c0_i32_0 = arith.constant 0 : i32
    %c0_i32_1 = arith.constant 0 : i32
    return %c0_i32, %c0_i32_0 : i32, i32
  }
  func.func @transform_16(%arg0: i32) -> (i32, i32) {
    %c0_i32 = arith.constant 0 : i32
    %c0_i32_0 = arith.constant 0 : i32
    %c0_i32_1 = arith.constant 0 : i32
    return %c0_i32, %c0_i32_0 : i32, i32
  }
}

</mosaic_0001>

<bundles_post_ra>
// kernel: tpu_custom_call.1
= control target key start
LH: loop header
LB: loop body
LE: loop exit
PB: predicated region body
PF: predicated region fallthrough
CT: control target
= control target key end

     0   :  { %s1203_s0 = inlined_call_operand.vmem [shape: f32[16,1], index: 0, kind: input, shape index: {}]   ;;  %s1204_s1 = inlined_call_operand.vmem [shape: f32[16,16], index: 1, kind: input, shape index: {}]   ;;  %s1205_s2 = inlined_call_operand.vmem [shape: f32[16,16], index: 2, kind: input, shape index: {}]   ;;  %s1206_s3 = inlined_call_operand.hbm [shape: f32[16,16], index: 3, kind: input, shape index: {}]   ;;  %s1207_s4 = inlined_call_operand.vmem [shape: f32[16,1], index: 4, kind: input, shape index: {}]   ;;  %s1208_s5 = inlined_call_operand.vmem [shape: f32[8,16], index: 5, kind: input, shape index: {}]   ;;  %s1209_s6 = inlined_call_operand.<no memory space> [shape: f32[1,1], index: 6, kind: input, shape index: {}]   ;;  %s1210_s8 = inlined_call_operand.vmem [shape: f32[1,128], index: 8, kind: input, shape index: {}]   ;;  %s1211_s9 = inlined_call_operand.vmem [shape: f32[1,128], index: 9, kind: input, shape index: {}]   ;;  %s1212_s10 = inlined_call_operand.hbm [shape: f32[128,128], index: 10, kind: input, shape index: {}]   ;;  %s1213_s11 = inlined_call_operand.vmem [shape: f32[1,128], index: 11, kind: input, shape index: {}]   ;;  %s1214_s12 = inlined_call_operand.hbm [shape: f32[128,128], index: 12, kind: input, shape index: {}]   ;;  %s1215_s13 = inlined_call_operand.vmem [shape: f32[1,128], index: 13, kind: input, shape index: {}]   ;;  %s1216_s14 = inlined_call_operand.hbm [shape: f32[128,128], index: 14, kind: input, shape index: {}]   ;;  %s1217_s15 = inlined_call_operand.vmem [shape: f32[1,128], index: 15, kind: input, shape index: {}]   ;;  %s1218_s16 = inlined_call_operand.hbm [shape: f32[8,128], index: 16, kind: output, shape index: {}]   ;;  %s1219_s7 = inlined_call_operand.<no memory space> [shape: f32[1,1], index: 7, kind: input, shape index: {}]  }
   0x1   :  { %1221 = sst [smem:[#allocation17_spill]] %s1203_s0  ;;  %v21_v0 = vstv %s1209_s6  ;;  %v23_v1 = vstv %s1219_s7 }
   0x2   :  { %22 = vst [vmem:[#allocation2] sm:$0x1] %v21_v0 }
   0x3   :  { %24 = vst [vmem:[#allocation3] sm:$0x1] %v23_v1 }
   0x4   :  { %25 = vsyncpa [#allocation5], 0 }
   0x5   :  { %26 = vsyncpa [#allocation8], 0 }
   0x6   :  { %27 = vsyncpa [#allocation11], 0 }
   0x7   :  { %28 = vsyncpa [#allocation6], 0  ;;  %s64_s27 = sshll.u32 %s1212_s10, 4  ;;  %s941_s28 = smov [#allocation7]   ;;  %s65_s27 = int_to_ptr.hbm [resolvable:$true] %s64_s27 }
   0x8   :  { %s66_s29 = sshll.u32 %s941_s28, 4  ;;  %s39_s0 = sshll.u32 %s1206_s3, 4  ;;  %s67_s29 = int_to_ptr.vmem [resolvable:$true] %s66_s29  ;;  %s40_s0 = int_to_ptr.hbm [resolvable:$true] %s39_s0 }
   0x9   :  { %s942_s17 = smov 128   ;;  %s943_s7 = smov 8  }
   0xa   :  { %72 = dma.hbm_to_vmem [thread:$0]  %s65_s27, 2048, %s67_s29, [#allocation8], %s942_s17, %s942_s17, %s943_s7  }
   0xb   :  { %s944_s18 = smov [#allocation4]   ;;  %s79_s22 = sshll.u32 %s1214_s12, 4  ;;  %s80_s22 = int_to_ptr.hbm [resolvable:$true] %s79_s22 }
   0xc   :  { %s41_s19 = sshll.u32 %s944_s18, 4  ;;  %s94_s24 = sshll.u32 %s1216_s14, 4  ;;  %s42_s19 = int_to_ptr.vmem [resolvable:$true] %s41_s19  ;;  %s95_s24 = int_to_ptr.hbm [resolvable:$true] %s94_s24 }
   0xd   :  { %47 = dma.hbm_to_vmem [thread:$0]  %s40_s0, 256, %s42_s19, [#allocation5], %s942_s17, %s942_s17, %s943_s7  }
   0xe   :  { %s945_s25 = smov [#allocation9]   ;;  %s946_s3 = smov [#allocation10]  }
   0xf   :  { %s81_s26 = sshll.u32 %s945_s25, 4  ;;  %s96_s27 = sshll.u32 %s946_s3, 4  ;;  %s82_s26 = int_to_ptr.vmem [resolvable:$true] %s81_s26  ;;  %s97_s27 = int_to_ptr.vmem [resolvable:$true] %s96_s27 }
  0x10   :  { %87 = dma.hbm_to_vmem [thread:$0]  %s80_s22, 2048, %s82_s26, [#allocation8], %s942_s17, %s942_s17, %s943_s7  }
  0x11   :  { %102 = dma.hbm_to_vmem [thread:$0]  %s95_s24, 2048, %s97_s27, [#allocation11], %s942_s17, %s942_s17, %s943_s7  }
  0x12   :  { %933 = dma.done.wait [#allocation5], 256  }
  0x13   :  { %934 = vsyncadd [#allocation5], 4294967040 }
  0x14   :  { %935 = dma.done.wait [#allocation8], 4096  }
  0x15   :  { %936 = vsyncadd [#allocation8], 4294963200 }
  0x16   :  { %937 = dma.done.wait [#allocation11], 2048  }
  0x17   :  { %938 = vsyncadd [#allocation11], 4294965248  ;;  %v121_v2 = vlaneseq  ;;  %vm136_vm2 = vcmask 130048   ;;  %v947_v6 = vmov 0.0   ;;  %v133_v8 = vld [vmem:[%s1204_s1 + $0x8] sm:$0xff]  ;;  %v132_v10 = vld [vmem:[%s1204_s1] sm:$0xff] }
  0x18   :  { %v948_v37 = vmov 1.0   ;;  %v788_v38 = vld [vmem:[#allocation2] ss:$0 sm:$0xff]  ;;  %s1222_s6 = sld [smem:[#allocation17_spill]]  ;;  %v949_v49 = vmov 0   ;;  %v292_v61 = vld [vmem:[#allocation4 + $0x8] sm:$0xff] }
  0x19   :  { %v1054_v3 = vshrl.u32 %v121_v2, 7  ;;  %v1056_v4 = vand.u32 127, %v121_v2  ;;  %780 = vset.pattern.permute.xlu1 %v949_v49  ;;  %781 = vset.pattern.permute.xlu0 %v949_v49  ;;  %v789_v51 = vld [vmem:[#allocation3] ss:$0 sm:$0xff]  ;;  %v291_v2 = vld [vmem:[#allocation4] sm:$0xff]  ;;  %s950_s12 = smov [#allocation12]  }
  0x1a   :  { %787 = vset.pattern.permute.xlu2 %v949_v49  ;;  %s730_s14 = sshll.u32 %s950_s12, 4  ;;  %s732_s1 = sshll.u32 %s1218_s16, 4  ;;  %s731_s14 = int_to_ptr.vmem [resolvable:$true] %s730_s14  ;;  %s733_s1 = int_to_ptr.hbm [resolvable:$true] %s732_s1 }
  0x1b   :  { %v1059_v5 = vadd.s32 8, %v1054_v3  ;;  %vm126_vm0 = vcmp.eq.s32.totalorder %v1054_v3, %v1056_v4  ;;  %vm281_vm12 = vcmp.lt.s32.totalorder %v1056_v4, %v1054_v3 }
  0x1c   :  { %v1072_v9 = vsel %vm126_vm0, 1.0, %v947_v6 }
  0x1d   :  { %vm127_vm1 = vcmp.eq.s32.totalorder %v1059_v5, %v1056_v4  ;;  %v134_v13 = vadd.f32 %v1072_v9, %v132_v10  ;;  %vm282_vm13 = vcmp.lt.s32.totalorder %v1056_v4, %v1059_v5  ;;  %v302_v5 = vld [vmem:[%s1207_s4 + $0x8] sm:$0xff] }
  0x1e   :  { %v1066_v7 = vsel %vm127_vm1, 1.0, %v947_v6  ;;  %v1090_v39 = vld [vmem:[%s1222_s6 + $0x8] sm:$0xff]  ;;  %v1096_v41 = vld [vmem:[%s1222_s6] sm:$0xff] }
  0x1f   :  { %v135_v11 = vadd.f32 %v1066_v7, %v133_v8  ;;  %v137_v14 = vsel %vm136_vm2, %v134_v13, 0.0  ;;  %v208_v40 = vmul.f32 %v788_v38, %v1090_v39  ;;  %v207_v42 = vmul.f32 %v788_v38, %v1096_v41 }
  0x21   :  { %v140_v12 = vsel %vm136_vm2, %v135_v11, 0.0  ;;  %233 = vmatpush.msra.mxu2 %v208_v40 }
  0x22   :  { %141 = vadd.xlane.f32.xlu0 %v140_v12 }
  0x23   :  { %234 = vmatpush.msra.mxu2 %v207_v42 }
  0x2a   :  { %138 = vadd.xlane.f32.xlu0 %v137_v14 }
  0x95   :  { %v142_v15 = vpop.xlane.xlu0 %141 }
  0x96   :  { %v146_v16 = vmax.f32 %v142_v15, 1e-30  ;;  %vm144_vm6 = vcmp.gt.f32.partialorder %v142_v15, 0.0 }
  0x98   :  { %795 = vrsqrt.f32 %v146_v16  ;;  %vm163_vm4 = vweird.f32 %v146_v16 }
  0x9d   :  { %v139_v17 = vpop.xlane.xlu0 %138 }
  0x9e   :  { %v796_v18 = vpop.eup %795  ;;  %v145_v19 = vmax.f32 %v139_v17, 1e-30  ;;  %vm143_vm10 = vcmp.gt.f32.partialorder %v139_v17, 0.0 }
  0x9f   :  { %v158_v20 = vmul.f32 %v796_v18, %v146_v16  ;;  %vm164_vm3 = vweird.f32 %v796_v18 }
  0xa0   :  { %797 = vrsqrt.f32 %v145_v19  ;;  %vm165_vm5 = vmor %vm163_vm4, %vm164_vm3  ;;  %vm153_vm8 = vweird.f32 %v145_v19 }
  0xa1   :  { %v159_v21 = vmul.f32 %v796_v18, %v158_v20 }
  0xa3   :  { %v160_v22 = vmul.f32 0.5, %v159_v21 }
  0xa5   :  { %v161_v23 = vsub.f32 1.5, %v160_v22 }
  0xa6   :  { %v798_v24 = vpop.eup %797 }
  0xa7   :  { %v148_v25 = vmul.f32 %v798_v24, %v145_v19  ;;  %v162_v26 = vmul.f32 %v796_v18, %v161_v23  ;;  %vm154_vm7 = vweird.f32 %v798_v24 }
  0xa8   :  { %vm155_vm9 = vmor %vm153_vm8, %vm154_vm7 }
  0xa9   :  { %v149_v27 = vmul.f32 %v798_v24, %v148_v25  ;;  %v166_v28 = vsel %vm165_vm5, %v796_v18, %v162_v26 }
  0xaa   :  { %v168_v29 = vsel %vm144_vm6, %v166_v28, 0.0  ;;  %v353_v28 = vld [vmem:[%s1205_s2 + $0x8] sm:$0xff] }
  0xab   :  { %v150_v30 = vmul.f32 0.5, %v149_v27  ;;  %v172_v31 = vmul.f32 %v1066_v7, %v168_v29  ;;  %v170_v47 = vmul.f32 %v168_v29, %v135_v11 }
  0xad   :  { %v151_v32 = vsub.f32 1.5, %v150_v30  ;;  %190 = vmatpush.msra.mxu0 %v172_v31  ;;  %768 = vmatpush.msra.mxu3 %v172_v31 }
  0xaf   :  { %v152_v33 = vmul.f32 %v798_v24, %v151_v32 }
  0xb1   :  { %v156_v34 = vsel %vm155_vm9, %v798_v24, %v152_v33 }
  0xb2   :  { %v167_v35 = vsel %vm143_vm10, %v156_v34, 0.0 }
  0xb3   :  { %v171_v36 = vmul.f32 %v1072_v9, %v167_v35  ;;  %v169_v43 = vmul.f32 %v167_v35, %v134_v13  ;;  %v301_v13 = vld [vmem:[%s1207_s4] sm:$0xff] }
  0xb5   :  { %191 = vmatpush.msra.mxu0 %v171_v36  ;;  %769 = vmatpush.msra.mxu3 %v171_v36 }
  0xb6   :  { %746 = vmatmul.msk.f32.vlgmr.msra.gmra.mxu0 %vm136_vm2, %v948_v37  ;;  %747 = vmatmul.msk.f32.vlgmr.msra.gmra.mxu3 %vm136_vm2, %v948_v37 }
 0x133   :  { %v193_v44 = vpop.f32.mrf.mxu0 }
 0x134   :  { %v199_v45 = vmul.f32 %v193_v44, %v169_v43  ;;  %v790_v44 = vld [vmem:[%s1210_s8] ss:$0 sm:$0xff] }
 0x136   :  { %748 = vmatmul.msk.f32.vlgmr.msra.gmra.mxu2 %vm136_vm2, %v199_v45 }
 0x139   :  { %v196_v46 = vpop.f32.mrf.mxu3 }
 0x13a   :  { %v200_v48 = vmul.f32 %v196_v46, %v170_v47 }
 0x13e   :  { %749 = vmatmul.msk.f32.gmra.mxu2 %vm136_vm2, %v200_v48 }
 0x1b9   :  { %v236_v50 = vpop.f32.mrf.mxu2 }
 0x1ba   :  { %v237_v54 = vadd.f32 %v789_v51, %v236_v50 }
 0x1c1   :  { %v239_v52 = vpop.f32.mrf.mxu2 }
 0x1c2   :  { %v240_v53 = vadd.f32 %v789_v51, %v239_v52 }
 0x1c4   :  { %249 = vperm.xlu1 %780, %v240_v53   ;;  %799 = vtanh.f32 %v240_v53 }
 0x1c5   :  { %801 = vtanh.f32 %v237_v54 }
 0x1ca   :  { %v800_v10 = vpop.eup %799 }
 0x1cb   :  { %v802_v15 = vpop.eup %801 }
 0x1cc   :  { %244 = vperm.xlu1 %780, %v237_v54  }
 0x236   :  { %v250_v55 = vpop.permute.xlu1 %249 }
 0x237   :  { %v253_v56 = vmul.f32 %v1066_v7, %v250_v55 }
 0x239   :  { %268 = vmatpush.msrb.mxu2 %v253_v56 }
 0x23e   :  { %v245_v57 = vpop.permute.xlu1 %244 }
 0x23f   :  { %v252_v58 = vmul.f32 %v1072_v9, %v245_v57 }
 0x241   :  { %269 = vmatpush.msrb.mxu2 %v252_v58 }
 0x242   :  { %750 = vmatmul.msk.f32.vlgmr.msrb.gmra.mxu2 %vm136_vm2, %v948_v37 }
 0x24a   :  { %751 = vmatmul.msk.f32.gmra.mxu2 %vm136_vm2, %v948_v37 }
 0x2c5   :  { %v271_v59 = vpop.f32.mrf.mxu2 }
 0x2c6   :  { %vm279_vm11 = vcmp.eq.f32.partialorder %v271_v59, %v245_v57  ;;  %vm277_vm1 = vcmp.gt.f32.partialorder %v271_v59, %v245_v57 }
 0x2c7   :  { %vm283_vm14 = vmand %vm279_vm11, %vm281_vm12 }
 0x2c8   :  { %vm285_vm5 = vmor %vm277_vm1, %vm283_vm14 }
 0x2c9   :  { %v752_v1 = vsel %vm285_vm5, 1.0, %v947_v6 }
 0x2ca   :  { %v293_v3 = vmul.f32 %v752_v1, %v291_v2 }
 0x2cc   :  { %v295_v4 = vsel %vm136_vm2, %v293_v3, 0.0  ;;  %v487_v3 = vld [vmem:[#allocation7 + $0x78] sm:$0xff] }
 0x2cd   :  { %v274_v60 = vpop.f32.mrf.mxu2  ;;  %488 = vmatpush.msra.mxu2 %v487_v3 }
 0x2ce   :  { %vm278_vm15 = vcmp.gt.f32.partialorder %v274_v60, %v250_v55  ;;  %vm280_vm0 = vcmp.eq.f32.partialorder %v274_v60, %v250_v55 }
 0x2cf   :  { %vm284_vm3 = vmand %vm280_vm0, %vm282_vm13 }
 0x2d0   :  { %vm286_vm4 = vmor %vm278_vm15, %vm284_vm3 }
 0x2d1   :  { %v753_v62 = vsel %vm286_vm4, 1.0, %v947_v6 }
 0x2d2   :  { %v294_v63 = vmul.f32 %v753_v62, %v292_v61 }
 0x2d4   :  { %v298_v0 = vsel %vm136_vm2, %v294_v63, 0.0 }
 0x2d5   :  { %299 = vadd.xlane.f32.xlu2 %v298_v0 }
 0x2dd   :  { %296 = vadd.xlane.f32.xlu2 %v295_v4  ;;  %v486_v4 = vld [vmem:[#allocation7 + $0x70] sm:$0xff] }
 0x2de   :  { %489 = vmatpush.msra.mxu2 %v486_v4  ;;  %v793_v4 = vld [vmem:[%s1215_s13] ss:$0 sm:$0xff] }
 0x348   :  { %v300_v8 = vpop.xlane.xlu2 %299 }
 0x349   :  { %vm304_vm6 = vcmp.lt.f32.partialorder %v300_v8, %v302_v5  ;;  %v485_v5 = vld [vmem:[#allocation7 + $0x68] sm:$0xff]  ;;  %v484_v8 = vld [vmem:[#allocation7 + $0x60] sm:$0xff] }
 0x34a   :  { %v755_v11 = vsel %vm304_vm6, 1.0, %v947_v6  ;;  %490 = vmatpush.msra.mxu2 %v485_v5 }
 0x34b   :  { %v312_v12 = vmul.f32 %v800_v10, %v755_v11  ;;  %v483_v10 = vld [vmem:[#allocation7 + $0x58] sm:$0xff] }
 0x34c   :  { %491 = vmatpush.msra.mxu2 %v484_v8 }
 0x34d   :  { %v314_v35 = vmul.f32 %v312_v12, %v1090_v39  ;;  %v479_v12 = vld [vmem:[#allocation7 + $0x38] sm:$0xff] }
 0x34e   :  { %492 = vmatpush.msra.mxu2 %v483_v10 }
 0x34f   :  { %v316_v36 = vmax.f32 %v314_v35, 0.0  ;;  %v553_v35 = vld [vmem:[#allocation9 + $0x68] sm:$0xff] }
 0x350   :  { %v297_v14 = vpop.xlane.xlu2 %296 }
 0x351   :  { %vm303_vm7 = vcmp.lt.f32.partialorder %v297_v14, %v301_v13  ;;  %v478_v13 = vld [vmem:[#allocation7 + $0x30] sm:$0xff] }
 0x352   :  { %v754_v16 = vsel %vm303_vm7, 1.0, %v947_v6  ;;  %v352_v6 = vld [vmem:[%s1205_s2] sm:$0xff] }
 0x353   :  { %v782_v17 = vpack.i.bf16 %v754_v16, %v755_v11  ;;  %v311_v18 = vmul.f32 %v802_v15, %v754_v16  ;;  %v481_v11 = vld [vmem:[#allocation7 + $0x48] sm:$0xff]  ;;  %v476_v15 = vld [vmem:[#allocation7 + $0x20] sm:$0xff] }
 0x355   :  { %783 = vperm.xlu0 %781, %v782_v17   ;;  %v313_v38 = vmul.f32 %v311_v18, %v1096_v41  ;;  %v475_v18 = vld [vmem:[#allocation7 + $0x18] sm:$0xff] }
 0x357   :  { %v315_v40 = vmax.f32 %v313_v38, 0.0  ;;  %v551_v38 = vld [vmem:[#allocation9 + $0x58] sm:$0xff] }
 0x3c7   :  { %v784_v19 = vpop.permute.xlu0 %783 }
 0x3c8   :  { %v786_v20 = vunpack.i.h.bf16 %v784_v19  ;;  %v785_v21 = vunpack.i.l.bf16 %v784_v19 }
 0x3ca   :  { %v1124_v22 = vmul.f32 %v785_v21, %v1066_v7  ;;  %v1127_v23 = vmul.f32 %v786_v20, %v1072_v9  ;;  %v354_v24 = vmul.f32 %v786_v20, %v352_v6  ;;  %v355_v30 = vmul.f32 %v785_v21, %v353_v28  ;;  %v474_v6 = vld [vmem:[#allocation7 + $0x10] sm:$0xff] }
 0x3cc   :  { %343 = vmatpush.msrb.mxu3 %v1124_v22 }
 0x3ce   :  { %344 = vmatpush.msrb.mxu3 %v1127_v23 }
 0x3cf   :  { %756 = vmatmul.msk.f32.vlgmr.msrb.gmra.mxu3 %vm136_vm2, %v948_v37 }
 0x3d7   :  { %757 = vmatmul.msk.f32.gmra.mxu3 %vm136_vm2, %v948_v37 }
 0x452   :  { %v346_v25 = vpop.f32.mrf.mxu3 }
 0x453   :  { %v356_v26 = vmul.f32 %v354_v24, %v346_v25  ;;  %v473_v24 = vld [vmem:[#allocation7 + $0x8] sm:$0xff]  ;;  %v472_v25 = vld [vmem:[#allocation7] sm:$0xff] }
 0x455   :  { %v1139_v27 = vadd.f32 %v356_v26, %v1127_v23  ;;  %v791_v26 = vld [vmem:[%s1211_s9] ss:$0 sm:$0xff] }
 0x457   :  { %v360_v29 = vsel %vm136_vm2, %v1139_v27, 0.0 }
 0x458   :  { %361 = vadd.xlane.f32.xlu2 %v360_v29 }
 0x45a   :  { %v349_v31 = vpop.f32.mrf.mxu3 }
 0x45b   :  { %v357_v32 = vmul.f32 %v355_v30, %v349_v31 }
 0x45d   :  { %v1147_v33 = vadd.f32 %v357_v32, %v1124_v22 }
 0x45f   :  { %v363_v34 = vsel %vm136_vm2, %v1147_v33, 0.0 }
 0x460   :  { %364 = vadd.xlane.f32.xlu1 %v363_v34  ;;  %v554_v34 = vld [vmem:[#allocation9 + $0x70] sm:$0xff] }
 0x470   :  { %429 = vperm.xlu2 %787, %v316_v36   ;;  %v552_v36 = vld [vmem:[#allocation9 + $0x60] sm:$0xff] }
 0x478   :  { %424 = vperm.xlu2 %787, %v315_v40   ;;  %v550_v40 = vld [vmem:[#allocation9 + $0x50] sm:$0xff] }
 0x4cb   :  { %v362_v42 = vpop.xlane.xlu2 %361 }
 0x4cc   :  { %v368_v43 = vmax.f32 %v362_v42, 1e-30  ;;  %vm366_vm14 = vcmp.gt.f32.partialorder %v362_v42, 0.0  ;;  %v549_v42 = vld [vmem:[#allocation9 + $0x48] sm:$0xff] }
 0x4ce   :  { %803 = vrsqrt.f32 %v368_v43  ;;  %vm376_vm9 = vweird.f32 %v368_v43 }
 0x4d3   :  { %v430_v45 = vpop.permute.xlu2 %429  ;;  %v365_v46 = vpop.xlane.xlu1 %364 }
 0x4d4   :  { %v804_v47 = vpop.eup %803  ;;  %v369_v48 = vmax.f32 %v365_v46, 1e-30  ;;  %v436_v49 = vmul.f32 %v790_v44, %v430_v45  ;;  %vm367_vm15 = vcmp.gt.f32.partialorder %v365_v46, 0.0  ;;  %v547_v45 = vld [vmem:[#allocation9 + $0x38] sm:$0xff]  ;;  %v546_v46 = vld [vmem:[#allocation9 + $0x30] sm:$0xff] }
 0x4d5   :  { %v371_v50 = vmul.f32 %v804_v47, %v368_v43  ;;  %vm377_vm8 = vweird.f32 %v804_v47 }
 0x4d6   :  { %805 = vrsqrt.f32 %v369_v48  ;;  %461 = vmatpush.msra.mxu1 %v436_v49  ;;  %vm378_vm11 = vmor %vm376_vm9, %vm377_vm8  ;;  %vm386_vm12 = vweird.f32 %v369_v48  ;;  %v544_v49 = vld [vmem:[#allocation9 + $0x20] sm:$0xff] }
 0x4d7   :  { %v372_v39 = vmul.f32 %v804_v47, %v371_v50  ;;  %v543_v50 = vld [vmem:[#allocation9 + $0x18] sm:$0xff] }
 0x4d9   :  { %v373_v51 = vmul.f32 0.5, %v372_v39  ;;  %v542_v39 = vld [vmem:[#allocation9 + $0x10] sm:$0xff] }
 0x4db   :  { %v425_v41 = vpop.permute.xlu2 %424  ;;  %v374_v54 = vsub.f32 1.5, %v373_v51  ;;  %v541_v51 = vld [vmem:[#allocation9 + $0x8] sm:$0xff] }
 0x4dc   :  { %v806_v52 = vpop.eup %805  ;;  %v435_v53 = vmul.f32 %v790_v44, %v425_v41  ;;  %v548_v44 = vld [vmem:[#allocation9 + $0x40] sm:$0xff] }
 0x4dd   :  { %v381_v55 = vmul.f32 %v806_v52, %v369_v48  ;;  %v375_v58 = vmul.f32 %v804_v47, %v374_v54  ;;  %vm387_vm10 = vweird.f32 %v806_v52  ;;  %v540_v41 = vld [vmem:[#allocation9] sm:$0xff] }
 0x4de   :  { %462 = vmatpush.msra.mxu1 %v435_v53  ;;  %vm388_vm13 = vmor %vm386_vm12, %vm387_vm10 }
 0x4df   :  { %v382_v56 = vmul.f32 %v806_v52, %v381_v55  ;;  %v379_v61 = vsel %vm378_vm11, %v804_v47, %v375_v58  ;;  %v545_v47 = vld [vmem:[#allocation9 + $0x28] sm:$0xff] }
 0x4e0   :  { %v390_v0 = vsel %vm366_vm14, %v379_v61, 0.0 }
 0x4e1   :  { %v383_v57 = vmul.f32 0.5, %v382_v56  ;;  %v394_v2 = vmul.f32 %v1072_v9, %v390_v0  ;;  %v480_v9 = vld [vmem:[#allocation7 + $0x40] sm:$0xff]  ;;  %v392_v14 = vmul.f32 %v390_v0, %v1139_v27  ;;  %v687_v0 = vld [vmem:[#allocation10 + $0x68] sm:$0xff] }
 0x4e3   :  { %v384_v59 = vsub.f32 1.5, %v383_v57  ;;  %v608_v57 = vld [vmem:[%s1208_s5] sm:$0xff] }
 0x4e5   :  { %v385_v60 = vmul.f32 %v806_v52, %v384_v59 }
 0x4e7   :  { %v389_v62 = vsel %vm388_vm13, %v806_v52, %v385_v60  ;;  %v792_v52 = vld [vmem:[%s1213_s11] ss:$0 sm:$0xff] }
 0x4e8   :  { %v391_v63 = vsel %vm367_vm15, %v389_v62, 0.0  ;;  %v689_v62 = vld [vmem:[#allocation10 + $0x78] sm:$0xff] }
 0x4e9   :  { %v395_v1 = vmul.f32 %v1066_v7, %v391_v63  ;;  %v482_v7 = vld [vmem:[#allocation7 + $0x50] sm:$0xff]  ;;  %v393_v19 = vmul.f32 %v391_v63, %v1147_v33  ;;  %v555_v33 = vld [vmem:[#allocation9 + $0x78] sm:$0xff] }
 0x4ea   :  { %493 = vmatpush.msra.mxu2 %v482_v7  ;;  %v688_v63 = vld [vmem:[#allocation10 + $0x70] sm:$0xff] }
 0x4eb   :  { %410 = vmatpush.msrb.mxu0 %v395_v1  ;;  %v686_v1 = vld [vmem:[#allocation10 + $0x60] sm:$0xff] }
 0x4ec   :  { %494 = vmatpush.msra.mxu2 %v481_v11 }
 0x4ed   :  { %411 = vmatpush.msrb.mxu0 %v394_v2  ;;  %v685_v2 = vld [vmem:[#allocation10 + $0x58] sm:$0xff] }
 0x4ee   :  { %758 = vmatmul.msk.f32.vlgmr.msrb.gmra.mxu0 %vm136_vm2, %v948_v37  ;;  %495 = vmatpush.msra.mxu2 %v480_v9  ;;  %v684_v9 = vld [vmem:[#allocation10 + $0x50] sm:$0xff] }
 0x4ef   :  { %556 = vmatpush.msra.mxu0 %v555_v33 }
 0x4f0   :  { %496 = vmatpush.msra.mxu2 %v479_v12  ;;  %v683_v12 = vld [vmem:[#allocation10 + $0x48] sm:$0xff] }
 0x4f1   :  { %557 = vmatpush.msra.mxu0 %v554_v34 }
 0x4f2   :  { %497 = vmatpush.msra.mxu2 %v478_v13  ;;  %v682_v13 = vld [vmem:[#allocation10 + $0x40] sm:$0xff] }
 0x4f3   :  { %558 = vmatpush.msra.mxu0 %v553_v35 }
 0x4f5   :  { %559 = vmatpush.msra.mxu0 %v552_v36  ;;  %v794_v36 = vld [vmem:[%s1217_s15] ss:$0 sm:$0xff] }
 0x4f6   :  { %759 = vmatmul.msk.f32.gmra.mxu0 %vm136_vm2, %v948_v37  ;;  %v477_v37 = vld [vmem:[#allocation7 + $0x28] sm:$0xff] }
 0x4f7   :  { %498 = vmatpush.msra.mxu2 %v477_v37  ;;  %560 = vmatpush.msra.mxu0 %v551_v38  ;;  %v681_v37 = vld [vmem:[#allocation10 + $0x38] sm:$0xff] }
 0x4f9   :  { %499 = vmatpush.msra.mxu2 %v476_v15  ;;  %561 = vmatpush.msra.mxu0 %v550_v40  ;;  %v679_v15 = vld [vmem:[#allocation10 + $0x28] sm:$0xff] }
 0x4fb   :  { %500 = vmatpush.msra.mxu2 %v475_v18  ;;  %562 = vmatpush.msra.mxu0 %v549_v42  ;;  %v676_v18 = vld [vmem:[#allocation10 + $0x10] sm:$0xff] }
 0x4fd   :  { %501 = vmatpush.msra.mxu2 %v474_v6  ;;  %563 = vmatpush.msra.mxu0 %v548_v44  ;;  %v674_v6 = vld [vmem:[#allocation10] sm:$0xff] }
 0x4ff   :  { %502 = vmatpush.msra.mxu2 %v473_v24  ;;  %564 = vmatpush.msra.mxu0 %v547_v45 }
 0x501   :  { %503 = vmatpush.msra.mxu2 %v472_v25  ;;  %565 = vmatpush.msra.mxu0 %v546_v46 }
 0x503   :  { %566 = vmatpush.msra.mxu0 %v545_v47 }
 0x505   :  { %567 = vmatpush.msra.mxu0 %v544_v49 }
 0x507   :  { %568 = vmatpush.msra.mxu0 %v543_v50 }
 0x509   :  { %569 = vmatpush.msra.mxu0 %v542_v39 }
 0x50b   :  { %570 = vmatpush.msra.mxu0 %v541_v51 }
 0x50d   :  { %571 = vmatpush.msra.mxu0 %v540_v41 }
 0x56b   :  { %v413_v16 = vpop.f32.mrf.mxu0 }
 0x56c   :  { %v1163_v17 = vmul.f32 %v413_v16, %v392_v14  ;;  %v680_v14 = vld [vmem:[#allocation10 + $0x30] sm:$0xff]  ;;  %v678_v16 = vld [vmem:[#allocation10 + $0x20] sm:$0xff] }
 0x56e   :  { %760 = vmatmul.msk.f32.vlgmr.msra.gmra.mxu1 %vm136_vm2, %v1163_v17 }
 0x573   :  { %v416_v20 = vpop.f32.mrf.mxu0 }
 0x574   :  { %v1168_v21 = vmul.f32 %v416_v20, %v393_v19 }
 0x576   :  { %761 = vmatmul.msk.f32.gmra.mxu1 %vm136_vm2, %v1168_v21 }
 0x5eb   :  { %v464_v27 = vpop.f32.mrf.mxu1 }
 0x5ec   :  { %v465_v28 = vadd.f32 %v791_v26, %v464_v27 }
 0x5ee   :  { %v470_v29 = vmax.f32 %v465_v28, 0.0 }
 0x5f0   :  { %504 = vmatmul.f32.vlgmr.msra.gmra.mxu2 %v470_v29 }
 0x5f3   :  { %v467_v30 = vpop.f32.mrf.mxu1 }
 0x5f4   :  { %v468_v31 = vadd.f32 %v791_v26, %v467_v30 }
 0x5f6   :  { %v471_v32 = vmax.f32 %v468_v31, 0.0 }
 0x5f8   :  { %507 = vmatmul.f32.gmra.mxu2 %v471_v32 }
 0x673   :  { %v505_v43 = vpop.f32.mrf.mxu2 }
 0x67b   :  { %v508_v48 = vpop.f32.mrf.mxu2 }
 0x67c   :  { %529 = vmatpush.msra.mxu3 %v508_v48 }
 0x67e   :  { %530 = vmatpush.msra.mxu3 %v505_v43 }
 0x67f   :  { %762 = vmatmul.msk.f32.vlgmr.msra.gmra.mxu3 %vm136_vm2, %v1163_v17 }
 0x680   :  { %626 = vmatpush.msrb.mxu3 %v1124_v22 }
 0x682   :  { %627 = vmatpush.msrb.mxu3 %v1127_v23 }
 0x687   :  { %763 = vmatmul.msk.f32.gmra.mxu3 %vm136_vm2, %v1168_v21 }
 0x68f   :  { %766 = vmatmul.msk.f32.vlgmr.msrb.gmra.mxu3 %vm136_vm2, %v608_v57 }
 0x702   :  { %v532_v53 = vpop.f32.mrf.mxu3 }
 0x703   :  { %v533_v54 = vadd.f32 %v792_v52, %v532_v53 }
 0x705   :  { %v538_v55 = vmax.f32 %v533_v54, 0.0 }
 0x707   :  { %572 = vmatmul.f32.vlgmr.msra.gmra.mxu0 %v538_v55 }
 0x70a   :  { %v535_v22 = vpop.f32.mrf.mxu3 }
 0x70b   :  { %v536_v56 = vadd.f32 %v792_v52, %v535_v22 }
 0x70d   :  { %v539_v23 = vmax.f32 %v536_v56, 0.0 }
 0x70f   :  { %575 = vmatmul.f32.gmra.mxu0 %v539_v23 }
 0x712   :  { %v629_v60 = vpop.f32.mrf.mxu3 }
 0x713   :  { %v632_v61 = vsel %vm136_vm2, %v629_v60, 0.0 }
 0x714   :  { %633 = vadd.xlane.f32.xlu0 %v632_v61 }
 0x784   :  { %v573_v58 = vpop.f32.mrf.mxu0 }
 0x787   :  { %v634_v19 = vpop.xlane.xlu0 %633 }
 0x788   :  { %v635_v20 = vmax.f32 %v634_v19, 1.0 }
 0x78a   :  { %807 = vrcp.f32 %v635_v20  ;;  %v670_v28 = vand.u32 2147483648, %v635_v20  ;;  %v668_v30 = vand.u32 2147483647, %v635_v20 }
 0x78c   :  { %v576_v59 = vpop.f32.mrf.mxu0  ;;  %v671_v31 = vor.u32 1.1754944e-38, %v670_v28  ;;  %vm669_vm3 = vcmp.eq.f32.partialorder %v668_v30, 8.507059e+37 }
 0x78d   :  { %597 = vmatpush.msrb.mxu1 %v576_v59 }
 0x78f   :  { %598 = vmatpush.msrb.mxu1 %v573_v58 }
 0x790   :  { %764 = vmatmul.msk.f32.vlgmr.msrb.gmra.mxu1 %vm136_vm2, %v1163_v17  ;;  %v677_v17 = vld [vmem:[#allocation10 + $0x18] sm:$0xff]  ;;  %v808_v24 = vpop.eup %807 }
 0x791   :  { %694 = vmatpush.msra.mxu1 %v689_v62  ;;  %v660_v25 = vmul.f32 %v808_v24, %v635_v20  ;;  %vm665_vm0 = vweird.f32 %v808_v24 }
 0x793   :  { %695 = vmatpush.msra.mxu1 %v688_v63  ;;  %v661_v26 = vsub.f32 1.0, %v660_v25 }
 0x795   :  { %696 = vmatpush.msra.mxu1 %v687_v0  ;;  %v662_v27 = vmul.f32 %v808_v24, %v661_v26 }
 0x797   :  { %697 = vmatpush.msra.mxu1 %v686_v1  ;;  %v663_v29 = vadd.f32 %v808_v24, %v662_v27 }
 0x798   :  { %765 = vmatmul.msk.f32.gmra.mxu1 %vm136_vm2, %v1168_v21  ;;  %v675_v21 = vld [vmem:[#allocation10 + $0x8] sm:$0xff] }
 0x799   :  { %698 = vmatpush.msra.mxu1 %v685_v2 }
 0x79b   :  { %699 = vmatpush.msra.mxu1 %v684_v9 }
 0x79d   :  { %700 = vmatpush.msra.mxu1 %v683_v12 }
 0x79f   :  { %701 = vmatpush.msra.mxu1 %v682_v13 }
 0x7a1   :  { %702 = vmatpush.msra.mxu1 %v681_v37 }
 0x7a3   :  { %703 = vmatpush.msra.mxu1 %v680_v14 }
 0x7a5   :  { %704 = vmatpush.msra.mxu1 %v679_v15 }
 0x7a7   :  { %705 = vmatpush.msra.mxu1 %v678_v16 }
 0x7a9   :  { %706 = vmatpush.msra.mxu1 %v677_v17 }
 0x7ab   :  { %707 = vmatpush.msra.mxu1 %v676_v18 }
 0x7ad   :  { %708 = vmatpush.msra.mxu1 %v675_v21 }
 0x7af   :  { %709 = vmatpush.msra.mxu1 %v674_v6 }
 0x80d   :  { %v600_v3 = vpop.f32.mrf.mxu1 }
 0x80e   :  { %v601_v8 = vadd.f32 %v793_v4, %v600_v3 }
 0x810   :  { %v606_v11 = vmax.f32 %v601_v8, 0.0 }
 0x815   :  { %v603_v5 = vpop.f32.mrf.mxu1 }
 0x816   :  { %v604_v10 = vadd.f32 %v793_v4, %v603_v5 }
 0x818   :  { %v607_v7 = vmax.f32 %v604_v10, 0.0 }
 0x81a   :  { %653 = vmatpush.msra.mxu3 %v607_v7 }
 0x81c   :  { %654 = vmatpush.msra.mxu3 %v606_v11 }
 0x81d   :  { %767 = vmatmul.msk.f32.vlgmr.msra.gmra.mxu3 %vm136_vm2, %v629_v60  ;;  %vm664_vm2 = vweird.f32 %v635_v20 }
 0x81e   :  { %vm666_vm1 = vmor %vm664_vm2, %vm665_vm0 }
 0x81f   :  { %v667_v32 = vsel %vm666_vm1, %v808_v24, %v663_v29 }
 0x820   :  { %v672_v34 = vsel %vm669_vm3, %v671_v31, %v667_v32 }
 0x8a0   :  { %v656_v33 = vpop.f32.mrf.mxu3 }
 0x8a1   :  { %v673_v35 = vmul.f32 %v672_v34, %v656_v33 }
 0x8a3   :  { %710 = vmatmul.f32.vlgmr.msra.gmra.mxu1 %v673_v35 }
 0x920   :  { %v711_v38 = vpop.f32.mrf.mxu1 }
 0x921   :  { %v712_v40 = vadd.f32 %v794_v36, %v711_v38 }
 0x923   :  { %714 = vmax.xlane.f32.xlu2 %v712_v40 }
 0x996   :  { %v715_v42 = vpop.xlane.xlu2 %714 }
 0x997   :  { %v716_v43 = vsub.f32 %v712_v40, %v715_v42 }
 0x999   :  { %v717_v44 = vmul.f32 1.442695, %v716_v43 }
 0x99b   :  { %809 = vpow2.f32 %v717_v44 }
 0x9a1   :  { %v810_v45 = vpop.eup %809 }
 0x9a2   :  { %719 = vadd.xlane.f32.xlu1 %v810_v45 }
 0xa15   :  { %v720_v46 = vpop.xlane.xlu1 %719 }
 0xa16   :  { %811 = vlog2.f32 %v720_v46 }
 0xa1c   :  { %v812_v47 = vpop.eup %811 }
 0xa1d   :  { %v722_v48 = vmul.f32 0.6931472, %v812_v47 }
 0xa1f   :  { %v723_v49 = vsub.f32 %v716_v43, %v722_v48 }
 0xa21   :  { %724 = vst [vmem:[#allocation12] sm:$0xff] %v723_v49 }
 0xa22   :  { %735 = dma.vmem_to_hbm [thread:$0]  %s731_s14, 128, %s733_s1, [#allocation6]  }
 0xa23   :  { %939 = dma.done.wait [#allocation6], 128  }
 0xa24   :  { %940 = vsyncadd [#allocation6], 4294967168 }
 0xa25   :  { %740 = vsyncpa [#allocation5], 1 }
 0xa26   :  { %741 = vsyncpa [#allocation8], 1 }
 0xa27   :  { %742 = vsyncpa [#allocation11], 1 }
 0xa28   :  { %743 = vsyncpa [#allocation6], 1 }

</bundles_post_ra>
